<compile_context>
chip_gen: v7x
topology: tpu7x:2x2x1
jax: 0.10.0
libtpu: 0.0.40
codegen_flags: <defaults>
</compile_context>

<pallas_src>
import math

import jax
import jax.numpy as jnp
from jax.experimental import pallas as pl
from jax.experimental.pallas import tpu as pltpu

PROB_MXU_LANES = 128  # W5 padded to a full lane tile for the MXU (store slices lane 0)


def _round_up(a, m):
    return ((a + m - 1) // m) * m


# --------------------------------------------------------------------------------------
# One-time parameter packing (do NOT call per forward pass)
# --------------------------------------------------------------------------------------
def pack_vdb_params(params):
    """Packs (w1,b1,...,w5,b5) into MXU/lane-friendly fused+padded weights.

    Weights are stored pre-transposed as [in_features, out_features] so the kernel
    computes y = x @ W + b (== PyTorch's x @ weight.T + bias).
    """
    w1, b1, w2, b2, w3, b3, w4, b4, w5, b5 = params
    D, H = w1.shape
    Z = w2.shape[1]
    HP = max(128, _round_up(H, 128))  # lane-dense hidden dim (zero-padded => exact math)
    f32 = jnp.float32

    w1p = jnp.zeros((D, HP), f32).at[:, :H].set(w1)
    b1p = jnp.zeros((1, HP), f32).at[:, :H].set(b1)
    # fused mu|logvar head: one (HP, 2Z) matmul, split on a lane-tile boundary in-kernel
    w23 = jnp.zeros((HP, 2 * Z), f32).at[:H, :Z].set(w2).at[:H, Z:].set(w3)
    b23 = jnp.concatenate([b2, b3], axis=1).astype(f32)
    w4p = jnp.zeros((Z, HP), f32).at[:, :H].set(w4)
    b4p = jnp.zeros((1, HP), f32).at[:, :H].set(b4)
    w5p = jnp.zeros((HP, PROB_MXU_LANES), f32).at[:H, :1].set(w5)
    b5p = jnp.zeros((1, PROB_MXU_LANES), f32).at[:, :1].set(b5)
    return (w1p, b1p, w23, b23, w4p, b4p, w5p, b5p)


# --------------------------------------------------------------------------------------
# Kernel
# --------------------------------------------------------------------------------------
def vdb_kernel(x_ref, eps_ref,
               w1_ref, b1_ref, w23_ref, b23_ref,
               w4_ref, b4_ref, w5_ref, b5_ref,
               prob_ref, ml_ref):
    x = x_ref[...]
    Z = eps_ref.shape[1]

    # encoder
    h = jnp.tanh(
        jnp.dot(x, w1_ref[...], preferred_element_type=jnp.float32) + b1_ref[...]
    )

    # fused mu|logvar head: one 2Z-wide MXU pass, split on a lane-tile boundary
    ml = jnp.dot(h, w23_ref[...], preferred_element_type=jnp.float32) + b23_ref[...]
    mu = ml[:, :Z]
    logvar = ml[:, Z:]

    # reparameterize (eps supplied from outside for determinism vs. the reference)
    z = mu + jnp.exp(logvar * 0.5) * eps_ref[...]

    # discriminator (W5 padded to 128 lanes for the MXU; only lane 0 is real)
    h2 = jnp.tanh(
        jnp.dot(z, w4_ref[...], preferred_element_type=jnp.float32) + b4_ref[...]
    )
    logit = jnp.dot(h2, w5_ref[...], preferred_element_type=jnp.float32) + b5_ref[...]

    # lane-0 slice before the store: HBM writeback is (tb, 1), not a padded slab
    prob_ref[...] = jax.nn.sigmoid(logit[:, :1])
    ml_ref[...] = ml


# --------------------------------------------------------------------------------------
# Wrapper
# --------------------------------------------------------------------------------------
def vdb_forward(x, eps, packed, *, max_tile=1024):
    """x: (B, discrim_dim), eps: (B, z_size), packed: pack_vdb_params(...) output.

    Returns (prob (B,1), mu (B,Z), logvar (B,Z)).
    """
    w1p, b1p, w23, b23, w4p, b4p, w5p, b5p = packed
    weights = (w1p, b1p, w23, b23, w4p, b4p, w5p, b5p)
    B, D = x.shape
    Z = eps.shape[1]
    HP = w1p.shape[1]

    # ---- batch tiling -----------------------------------------------------------------
    bp8 = _round_up(max(B, 8), 8)
    tb = min(max_tile, bp8)
    if bp8 >= 16:
        # guarantee >=2 grid steps so v7x megacore shards batch tiles across both TCs
        tb = min(tb, _round_up(pl.cdiv(bp8, 2), 8))
    # prefer a tile that divides bp8 (skips the extra HBM pad copy of x/eps), but don't
    # shrink below half the target tile just to avoid a small pad
    t = tb
    while t >= 8 and bp8 % t != 0:
        t -= 8
    if t >= max(8, tb // 2):
        tb = t
    n_tiles = pl.cdiv(bp8, tb)
    bp = n_tiles * tb

    if bp != B:
        x = jnp.pad(x, ((0, bp - B), (0, 0)))
        eps = jnp.pad(eps, ((0, bp - B), (0, 0)))

    # ---- specs --------------------------------------------------------------------------
    def row_spec(width):
        return pl.BlockSpec((tb, width), lambda i: (i, 0),
                            memory_space=pltpu.MemorySpace.VMEM)

    def resident_spec():
        # whole-array, grid-invariant VMEM resident (weights / biases): single DMA
        return pl.BlockSpec(memory_space=pltpu.MemorySpace.VMEM)

    out_shapes = (
        jax.ShapeDtypeStruct((bp, 1), jnp.float32),        # prob (lane 0 only)
        jax.ShapeDtypeStruct((bp, 2 * Z), jnp.float32),    # fused mu|logvar
    )

    # ---- VMEM budget / cost hint --------------------------------------------------------
    weight_elems = sum(int(w.size) for w in weights)
    stream_row_elems = D + Z + 1 + 2 * Z                    # x, eps, prob, ml per row
    scratch_row_elems = HP + 2 * Z + Z + HP + PROB_MXU_LANES  # h, ml, z, h2, logit
    vmem_limit = int(2 * tb * stream_row_elems * 4          # double-buffered blocks
                     + tb * scratch_row_elems * 4           # live intermediates
                     + weight_elems * 4
                     + (8 << 20))                           # headroom
    vmem_limit = max(32 << 20, min(vmem_limit, 100 << 20))

    cost = pl.CostEstimate(
        flops=2 * bp * (D * HP + HP * 2 * Z + Z * HP + HP * PROB_MXU_LANES),
        transcendentals=bp * (2 * HP + Z + 1),              # tanh, tanh, exp, sigmoid
        bytes_accessed=4 * (bp * stream_row_elems + weight_elems),
    )

    prob_full, ml = pl.pallas_call(
        vdb_kernel,
        out_shape=out_shapes,
        grid_spec=pl.GridSpec(
            grid=(n_tiles,),
            in_specs=[row_spec(D), row_spec(Z)]
                     + [resident_spec() for _ in weights],
            out_specs=[row_spec(1), row_spec(2 * Z)],
        ),
        compiler_params=pltpu.CompilerParams(
            dimension_semantics=("parallel",),   # shard batch tiles across TCs (v7x)
            vmem_limit_bytes=vmem_limit,
        ),
        cost_estimate=cost,
    )(x, eps, *weights)

    prob = prob_full[:B]
    mu = ml[:B, :Z]
    logvar = ml[:B, Z:]
    return prob, mu, logvar


# --------------------------------------------------------------------------------------
# Demo / correctness check
# --------------------------------------------------------------------------------------
def init_linear(key, fan_in, fan_out):
    # PyTorch nn.Linear default init: U(-1/sqrt(fan_in), 1/sqrt(fan_in)),
    # weight stored transposed as (fan_in, fan_out); bias as (1, fan_out).
    kw, kb = jax.random.split(key)
    bound = 1.0 / math.sqrt(fan_in)
    w = jax.random.uniform(kw, (fan_in, fan_out), jnp.float32, -bound, bound)
    b = jax.random.uniform(kb, (1, fan_out), jnp.float32, -bound, bound)
    return w, b


if __name__ == "__main__":
    key = jax.random.PRNGKey(0)

    # small shapes consistent with the module
    obs_dim, act_dim = 8, 4
    discrim_dim = obs_dim + act_dim          # obs_dim + act_dim
    hidden = 32                              # hidden_sizes[0]
    z_size = 128
    batch = 8

    keys = jax.random.split(key, 8)
    w1, b1 = init_linear(keys[0], discrim_dim, hidden)
    w2, b2 = init_linear(keys[1], hidden, z_size)
    w3, b3 = init_linear(keys[2], hidden, z_size)
    w4, b4 = init_linear(keys[3], z_size, hidden)
    w5, b5 = init_linear(keys[4], hidden, 1)
    w5 = w5 * 0.1                            # self.fc5.weight.data.mul_(0.1)
    b5 = b5 * 0.0                            # self.fc5.bias.data.mul_(0.0)
    params = (w1, b1, w2, b2, w3, b3, w4, b4, w5, b5)

    packed = pack_vdb_params(params)         # one-time, off the per-call path

    x = jax.random.normal(keys[5], (batch, discrim_dim), jnp.float32)
    eps = jax.random.normal(keys[6], (batch, z_size), jnp.float32)

    prob, mu, logvar = vdb_forward(x, eps, packed)
    jax.block_until_ready((prob, mu, logvar))

    # reference check in plain JAX
    h_ref = jnp.tanh(x @ w1 + b1)
    mu_ref = h_ref @ w2 + b2
    lv_ref = h_ref @ w3 + b3
    z_ref = mu_ref + jnp.exp(lv_ref / 2) * eps
    h2_ref = jnp.tanh(z_ref @ w4 + b4)
    prob_ref = jax.nn.sigmoid(h2_ref @ w5 + b5)
    assert prob.shape == (batch, 1) and mu.shape == (batch, z_size)
    assert logvar.shape == (batch, z_size)
    assert jnp.allclose(prob, prob_ref, atol=1e-5)
    assert jnp.allclose(mu, mu_ref, atol=1e-5)
    assert jnp.allclose(logvar, lv_ref, atol=1e-5)

    print("KERNEL_OK")
</pallas_src>

<mosaic_0001>
module attributes {stable_mosaic.version = 11 : i64} {
  func.func @vdb_kernel(%arg0: i32, %arg1: memref<8x12xf32, #tpu.memory_space<vmem>>, %arg2: memref<8x128xf32, #tpu.memory_space<vmem>>, %arg3: memref<12x128xf32, #tpu.memory_space<vmem>>, %arg4: memref<1x128xf32, #tpu.memory_space<vmem>>, %arg5: memref<128x256xf32, #tpu.memory_space<vmem>>, %arg6: memref<1x256xf32, #tpu.memory_space<vmem>>, %arg7: memref<128x128xf32, #tpu.memory_space<vmem>>, %arg8: memref<1x128xf32, #tpu.memory_space<vmem>>, %arg9: memref<128x128xf32, #tpu.memory_space<vmem>>, %arg10: memref<1x128xf32, #tpu.memory_space<vmem>>, %arg11: memref<8x1xf32, #tpu.memory_space<vmem>>, %arg12: memref<8x256xf32, #tpu.memory_space<vmem>>) attributes {dimension_semantics = [#tpu.dimension_semantics<parallel>], iteration_bounds = array<i64: 1>, scalar_prefetch = 0 : i64, scratch_operands = 0 : i64, tpu.core_type = #tpu.core_type<tc>, window_params = [{transform_indices = @transform_0, window_bounds = array<i64: 8, 12>}, {transform_indices = @transform_1, window_bounds = array<i64: 8, 128>}, {pipeline_mode = #tpu.pipeline_mode<synchronous>, transform_indices = @transform_2, window_bounds = array<i64: 12, 128>}, {pipeline_mode = #tpu.pipeline_mode<synchronous>, transform_indices = @transform_3, window_bounds = array<i64: 1, 128>}, {pipeline_mode = #tpu.pipeline_mode<synchronous>, transform_indices = @transform_4, window_bounds = array<i64: 128, 256>}, {pipeline_mode = #tpu.pipeline_mode<synchronous>, transform_indices = @transform_5, window_bounds = array<i64: 1, 256>}, {pipeline_mode = #tpu.pipeline_mode<synchronous>, transform_indices = @transform_6, window_bounds = array<i64: 128, 128>}, {pipeline_mode = #tpu.pipeline_mode<synchronous>, transform_indices = @transform_7, window_bounds = array<i64: 1, 128>}, {pipeline_mode = #tpu.pipeline_mode<synchronous>, transform_indices = @transform_8, window_bounds = array<i64: 128, 128>}, {pipeline_mode = #tpu.pipeline_mode<synchronous>, transform_indices = @transform_9, window_bounds = array<i64: 1, 128>}, {transform_indices = @transform_10, window_bounds = array<i64: 8, 1>}, {transform_indices = @transform_11, window_bounds = array<i64: 8, 256>}]} {
    %c0 = arith.constant 0 : index
    %c0_0 = arith.constant 0 : index
    %0 = vector.load %arg1[%c0, %c0_0] : memref<8x12xf32, #tpu.memory_space<vmem>>, vector<8x12xf32>
    %c0_1 = arith.constant 0 : index
    %c0_2 = arith.constant 0 : index
    %1 = vector.load %arg3[%c0_1, %c0_2] : memref<12x128xf32, #tpu.memory_space<vmem>>, vector<12x128xf32>
    %cst = arith.constant dense<0.000000e+00> : vector<8x128xf32>
    %2 = tpu.matmul %0, %1, %cst {dimension_numbers = #tpu.dot_dimension_numbers<[1], [0], [0], [1], [0, 0, 1, 1], [], []>} : vector<8x12xf32>, vector<12x128xf32>, vector<8x128xf32> -> vector<8x128xf32>
    %c0_3 = arith.constant 0 : index
    %c0_4 = arith.constant 0 : index
    %3 = vector.load %arg4[%c0_3, %c0_4] : memref<1x128xf32, #tpu.memory_space<vmem>>, vector<1x128xf32>
    %4 = vector.broadcast %3 : vector<1x128xf32> to vector<8x128xf32>
    %5 = arith.addf %2, %4 : vector<8x128xf32>
    %6 = math.tanh %5 : vector<8x128xf32>
    %c0_5 = arith.constant 0 : index
    %c0_6 = arith.constant 0 : index
    %7 = vector.load %arg5[%c0_5, %c0_6] : memref<128x256xf32, #tpu.memory_space<vmem>>, vector<128x256xf32>
    %cst_7 = arith.constant dense<0.000000e+00> : vector<8x256xf32>
    %8 = tpu.matmul %6, %7, %cst_7 {dimension_numbers = #tpu.dot_dimension_numbers<[1], [0], [0], [1], [0, 0, 1, 1], [], []>} : vector<8x128xf32>, vector<128x256xf32>, vector<8x256xf32> -> vector<8x256xf32>
    %c0_8 = arith.constant 0 : index
    %c0_9 = arith.constant 0 : index
    %9 = vector.load %arg6[%c0_8, %c0_9] : memref<1x256xf32, #tpu.memory_space<vmem>>, vector<1x256xf32>
    %10 = vector.broadcast %9 : vector<1x256xf32> to vector<8x256xf32>
    %11 = arith.addf %8, %10 : vector<8x256xf32>
    %12 = vector.extract_strided_slice %11 {offsets = [0, 0], sizes = [8, 128], strides = [1, 1]} : vector<8x256xf32> to vector<8x128xf32>
    %13 = vector.extract_strided_slice %11 {offsets = [0, 128], sizes = [8, 128], strides = [1, 1]} : vector<8x256xf32> to vector<8x128xf32>
    %cst_10 = arith.constant 5.000000e-01 : f32
    %14 = vector.broadcast %cst_10 : f32 to vector<8x128xf32>
    %15 = arith.mulf %13, %14 : vector<8x128xf32>
    %16 = math.exp %15 : vector<8x128xf32>
    %c0_11 = arith.constant 0 : index
    %c0_12 = arith.constant 0 : index
    %17 = vector.load %arg2[%c0_11, %c0_12] : memref<8x128xf32, #tpu.memory_space<vmem>>, vector<8x128xf32>
    %18 = arith.mulf %16, %17 : vector<8x128xf32>
    %19 = arith.addf %12, %18 : vector<8x128xf32>
    %c0_13 = arith.constant 0 : index
    %c0_14 = arith.constant 0 : index
    %20 = vector.load %arg7[%c0_13, %c0_14] : memref<128x128xf32, #tpu.memory_space<vmem>>, vector<128x128xf32>
    %cst_15 = arith.constant dense<0.000000e+00> : vector<8x128xf32>
    %21 = tpu.matmul %19, %20, %cst_15 {dimension_numbers = #tpu.dot_dimension_numbers<[1], [0], [0], [1], [0, 0, 1, 1], [], []>} : vector<8x128xf32>, vector<128x128xf32>, vector<8x128xf32> -> vector<8x128xf32>
    %c0_16 = arith.constant 0 : index
    %c0_17 = arith.constant 0 : index
    %22 = vector.load %arg8[%c0_16, %c0_17] : memref<1x128xf32, #tpu.memory_space<vmem>>, vector<1x128xf32>
    %23 = vector.broadcast %22 : vector<1x128xf32> to vector<8x128xf32>
    %24 = arith.addf %21, %23 : vector<8x128xf32>
    %25 = math.tanh %24 : vector<8x128xf32>
    %c0_18 = arith.constant 0 : index
    %c0_19 = arith.constant 0 : index
    %26 = vector.load %arg9[%c0_18, %c0_19] : memref<128x128xf32, #tpu.memory_space<vmem>>, vector<128x128xf32>
    %cst_20 = arith.constant dense<0.000000e+00> : vector<8x128xf32>
    %27 = tpu.matmul %25, %26, %cst_20 {dimension_numbers = #tpu.dot_dimension_numbers<[1], [0], [0], [1], [0, 0, 1, 1], [], []>} : vector<8x128xf32>, vector<128x128xf32>, vector<8x128xf32> -> vector<8x128xf32>
    %c0_21 = arith.constant 0 : index
    %c0_22 = arith.constant 0 : index
    %28 = vector.load %arg10[%c0_21, %c0_22] : memref<1x128xf32, #tpu.memory_space<vmem>>, vector<1x128xf32>
    %29 = vector.broadcast %28 : vector<1x128xf32> to vector<8x128xf32>
    %30 = arith.addf %27, %29 : vector<8x128xf32>
    %31 = vector.extract_strided_slice %30 {offsets = [0, 0], sizes = [8, 1], strides = [1, 1]} : vector<8x128xf32> to vector<8x1xf32>
    %32 = arith.negf %31 : vector<8x1xf32>
    %33 = math.exp %32 : vector<8x1xf32>
    %cst_23 = arith.constant 1.000000e+00 : f32
    %34 = vector.broadcast %cst_23 : f32 to vector<8x1xf32>
    %35 = arith.addf %34, %33 : vector<8x1xf32>
    %36 = arith.divf %34, %35 : vector<8x1xf32>
    %c0_24 = arith.constant 0 : index
    %c0_25 = arith.constant 0 : index
    %37 = vector.load %arg11[%c0_24, %c0_25] : memref<8x1xf32, #tpu.memory_space<vmem>>, vector<8x1xf32>
    tpu.vector_store %arg11[%c0_24, %c0_25], %36 {strides = array<i32>} : memref<8x1xf32, #tpu.memory_space<vmem>>, vector<8x1xf32>,
    %c0_26 = arith.constant 0 : index
    %c0_27 = arith.constant 0 : index
    %38 = vector.load %arg12[%c0_26, %c0_27] : memref<8x256xf32, #tpu.memory_space<vmem>>, vector<8x256xf32>
    tpu.vector_store %arg12[%c0_26, %c0_27], %11 {strides = array<i32>} : memref<8x256xf32, #tpu.memory_space<vmem>>, vector<8x256xf32>,
    return
  }
  func.func @transform_0(%arg0: i32) -> (i32, i32) {
    %c0_i32 = arith.constant 0 : i32
    %c0_i32_0 = arith.constant 0 : i32
    return %arg0, %c0_i32 : i32, i32
  }
  func.func @transform_1(%arg0: i32) -> (i32, i32) {
    %c0_i32 = arith.constant 0 : i32
    %c0_i32_0 = arith.constant 0 : i32
    return %arg0, %c0_i32 : i32, i32
  }
  func.func @transform_2(%arg0: i32) -> (i32, i32) {
    %c0_i32 = arith.constant 0 : i32
    %c0_i32_0 = arith.constant 0 : i32
    %c0_i32_1 = arith.constant 0 : i32
    return %c0_i32, %c0_i32_0 : i32, i32
  }
  func.func @transform_3(%arg0: i32) -> (i32, i32) {
    %c0_i32 = arith.constant 0 : i32
    %c0_i32_0 = arith.constant 0 : i32
    %c0_i32_1 = arith.constant 0 : i32
    return %c0_i32, %c0_i32_0 : i32, i32
  }
  func.func @transform_4(%arg0: i32) -> (i32, i32) {
    %c0_i32 = arith.constant 0 : i32
    %c0_i32_0 = arith.constant 0 : i32
    %c0_i32_1 = arith.constant 0 : i32
    return %c0_i32, %c0_i32_0 : i32, i32
  }
  func.func @transform_5(%arg0: i32) -> (i32, i32) {
    %c0_i32 = arith.constant 0 : i32
    %c0_i32_0 = arith.constant 0 : i32
    %c0_i32_1 = arith.constant 0 : i32
    return %c0_i32, %c0_i32_0 : i32, i32
  }
  func.func @transform_6(%arg0: i32) -> (i32, i32) {
    %c0_i32 = arith.constant 0 : i32
    %c0_i32_0 = arith.constant 0 : i32
    %c0_i32_1 = arith.constant 0 : i32
    return %c0_i32, %c0_i32_0 : i32, i32
  }
  func.func @transform_7(%arg0: i32) -> (i32, i32) {
    %c0_i32 = arith.constant 0 : i32
    %c0_i32_0 = arith.constant 0 : i32
    %c0_i32_1 = arith.constant 0 : i32
    return %c0_i32, %c0_i32_0 : i32, i32
  }
  func.func @transform_8(%arg0: i32) -> (i32, i32) {
    %c0_i32 = arith.constant 0 : i32
    %c0_i32_0 = arith.constant 0 : i32
    %c0_i32_1 = arith.constant 0 : i32
    return %c0_i32, %c0_i32_0 : i32, i32
  }
  func.func @transform_9(%arg0: i32) -> (i32, i32) {
    %c0_i32 = arith.constant 0 : i32
    %c0_i32_0 = arith.constant 0 : i32
    %c0_i32_1 = arith.constant 0 : i32
    return %c0_i32, %c0_i32_0 : i32, i32
  }
  func.func @transform_10(%arg0: i32) -> (i32, i32) {
    %c0_i32 = arith.constant 0 : i32
    %c0_i32_0 = arith.constant 0 : i32
    return %arg0, %c0_i32 : i32, i32
  }
  func.func @transform_11(%arg0: i32) -> (i32, i32) {
    %c0_i32 = arith.constant 0 : i32
    %c0_i32_0 = arith.constant 0 : i32
    return %arg0, %c0_i32 : i32, i32
  }
}

</mosaic_0001>

<bundles_post_ra>
// kernel: tpu_custom_call.1
= control target key start
LH: loop header
LB: loop body
LE: loop exit
PB: predicated region body
PF: predicated region fallthrough
CT: control target
= control target key end

     0   :  { %17 = vsyncpa [#allocation3], 0  ;;  %s1166_s0 = inlined_call_operand.hbm [shape: f32[8,12], index: 0, kind: input, shape index: {}]   ;;  %s1167_s1 = inlined_call_operand.hbm [shape: f32[8,128], index: 1, kind: input, shape index: {}]   ;;  %s1168_s2 = inlined_call_operand.hbm [shape: f32[12,128], index: 2, kind: input, shape index: {}]   ;;  %s1169_s3 = inlined_call_operand.vmem [shape: f32[1,128], index: 3, kind: input, shape index: {}]   ;;  %s1170_s4 = inlined_call_operand.hbm [shape: f32[128,256], index: 4, kind: input, shape index: {}]   ;;  %s1171_s5 = inlined_call_operand.vmem [shape: f32[1,256], index: 5, kind: input, shape index: {}]   ;;  %s1172_s6 = inlined_call_operand.hbm [shape: f32[128,128], index: 6, kind: input, shape index: {}]   ;;  %s1173_s7 = inlined_call_operand.vmem [shape: f32[1,128], index: 7, kind: input, shape index: {}]   ;;  %s1174_s8 = inlined_call_operand.hbm [shape: f32[128,128], index: 8, kind: input, shape index: {}]   ;;  %s1175_s9 = inlined_call_operand.vmem [shape: f32[1,128], index: 9, kind: input, shape index: {}]   ;;  %s1176_s10 = inlined_call_operand.vmem [shape: f32[8,1], index: 10, kind: output, shape index: {0}]   ;;  %s1177_s11 = inlined_call_operand.hbm [shape: f32[8,256], index: 11, kind: output, shape index: {1}]  }
   0x1   :  { %18 = vsyncpa [#allocation6], 0 }
   0x2   :  { %19 = vsyncpa [#allocation9], 0 }
   0x3   :  { %20 = vsyncpa [#allocation12], 0 }
   0x4   :  { %21 = vsyncpa [#allocation4], 0  ;;  %s938_s17 = smov [#allocation5]   ;;  %s939_s19 = smov [#allocation8]  }
   0x5   :  { %s38_s18 = sshll.u32 %s938_s17, 4  ;;  %s61_s20 = sshll.u32 %s939_s19, 4  ;;  %s39_s18 = int_to_ptr.vmem [resolvable:$true] %s38_s18  ;;  %s1013_s20 = int_to_ptr.vmem [resolvable:$true] %s61_s20 }
   0x6   :  { %s774_s23 = scalar_lea.hbm %s1167_s1, 128 }
   0x7   :  { %p775_p0 = scmp.ne.s32.totalorder %s1167_s1, %s774_s23  ;;  %p778_p1 = scmp.lt.u32.totalorder %s774_s23, %s1167_s1 }
   0x9   :  { %p780_p2 = pnand %p778_p1, %p775_p0 }
   0xb   :  { %783 = shalt.err (!%p780_p2)
}
   0xc   :  { %s784_s28 = scalar_lea.vmem %s39_s18, 128  ;;  %p789_p4 = scmp.lt.s32.totalorder %s39_s18, %s39_s18 }
   0xd   :  { %p785_p3 = scmp.ne.s32.totalorder %s39_s18, %s784_s28  ;;  %p790_p5 = scmp.lt.s32.totalorder %s784_s28, %s784_s28 }
   0xf   :  { %p791_p6 = por %p790_p5, %p789_p4 }
  0x11   :  { %p792_p7 = pnand %p791_p6, %p785_p3 }
  0x13   :  { %795 = shalt.err (!%p792_p7)
}
  0x14   :  { %41 = dma.hbm_to_vmem [thread:$0]  %s1167_s1, 128, %s39_s18, [#allocation6]  }
  0x15   :  { %s796_s14 = scalar_lea.hbm %s1170_s4, 4096 }
  0x16   :  { %p797_p8 = scmp.ne.s32.totalorder %s1170_s4, %s796_s14  ;;  %p800_p9 = scmp.lt.u32.totalorder %s796_s14, %s1170_s4 }
  0x18   :  { %p802_p10 = pnand %p800_p9, %p797_p8 }
  0x1a   :  { %805 = shalt.err (!%p802_p10)
}
  0x1b   :  { %s806_s21 = scalar_lea.vmem %s1013_s20, 4096  ;;  %p811_p12 = scmp.lt.s32.totalorder %s1013_s20, %s1013_s20 }
  0x1c   :  { %p807_p11 = scmp.ne.s32.totalorder %s1013_s20, %s806_s21  ;;  %p812_p13 = scmp.lt.s32.totalorder %s806_s21, %s806_s21 }
  0x1e   :  { %p813_p0 = por %p812_p13, %p811_p12 }
  0x20   :  { %p814_p1 = pnand %p813_p0, %p807_p11 }
  0x22   :  { %817 = shalt.err (!%p814_p1)
}
  0x23   :  { %s940_s1 = smov 256   ;;  %s941_s18 = smov 16  }
  0x24   :  { %67 = dma.hbm_to_vmem [thread:$0]  %s1170_s4, 4096, %s1013_s20, [#allocation9], %s940_s1, %s940_s1, %s941_s18  }
  0x25   :  { %s942_s24 = smov [#allocation2]   ;;  %s943_s26 = smov [#allocation7]  }
  0x26   :  { %s28_s25 = sshll.u32 %s942_s24, 4  ;;  %s47_s27 = sshll.u32 %s943_s26, 4  ;;  %s29_s25 = int_to_ptr.vmem [resolvable:$true] %s28_s25  ;;  %s1044_s27 = int_to_ptr.vmem [resolvable:$true] %s47_s27 }
  0x27   :  { %s818_s30 = scalar_lea.hbm %s1166_s0, 128 }
  0x28   :  { %p819_p2 = scmp.ne.s32.totalorder %s1166_s0, %s818_s30  ;;  %p822_p3 = scmp.lt.u32.totalorder %s818_s30, %s1166_s0 }
  0x2a   :  { %p824_p4 = pnand %p822_p3, %p819_p2 }
  0x2c   :  { %827 = shalt.err (!%p824_p4)
}
  0x2d   :  { %s828_s4 = scalar_lea.vmem %s29_s25, 128  ;;  %p833_p6 = scmp.lt.s32.totalorder %s29_s25, %s29_s25 }
  0x2e   :  { %p829_p5 = scmp.ne.s32.totalorder %s29_s25, %s828_s4  ;;  %p834_p7 = scmp.lt.s32.totalorder %s828_s4, %s828_s4 }
  0x30   :  { %p835_p8 = por %p834_p7, %p833_p6 }
  0x32   :  { %p836_p9 = pnand %p835_p8, %p829_p5 }
  0x34   :  { %839 = shalt.err (!%p836_p9)
}
  0x35   :  { %31 = dma.hbm_to_vmem [thread:$0]  %s1166_s0, 128, %s29_s25, [#allocation3]  }
  0x36   :  { %s840_s21 = scalar_lea.hbm %s1168_s2, 256 }
  0x37   :  { %p841_p10 = scmp.ne.s32.totalorder %s1168_s2, %s840_s21  ;;  %p844_p11 = scmp.lt.u32.totalorder %s840_s21, %s1168_s2 }
  0x39   :  { %p846_p12 = pnand %p844_p11, %p841_p10 }
  0x3b   :  { %849 = shalt.err (!%p846_p12)
}
  0x3c   :  { %s850_s24 = scalar_lea.vmem %s1044_s27, 256  ;;  %p855_p0 = scmp.lt.s32.totalorder %s1044_s27, %s1044_s27 }
  0x3d   :  { %p851_p13 = scmp.ne.s32.totalorder %s1044_s27, %s850_s24  ;;  %p856_p1 = scmp.lt.s32.totalorder %s850_s24, %s850_s24 }
  0x3f   :  { %p857_p2 = por %p856_p1, %p855_p0 }
  0x41   :  { %p858_p3 = pnand %p857_p2, %p851_p13 }
  0x43   :  { %861 = shalt.err (!%p858_p3)
}
  0x44   :  { %s944_s0 = smov 128   ;;  %s945_s25 = smov 8  }
  0x45   :  { %53 = dma.hbm_to_vmem [thread:$0]  %s1168_s2, 256, %s1044_s27, [#allocation6], %s944_s0, %s944_s0, %s945_s25  }
  0x46   :  { %s946_s29 = smov [#allocation10]   ;;  %s947_s12 = smov [#allocation11]  }
  0x47   :  { %s75_s30 = sshll.u32 %s946_s29, 4  ;;  %s89_s13 = sshll.u32 %s947_s12, 4  ;;  %s76_s30 = int_to_ptr.vmem [resolvable:$true] %s75_s30  ;;  %s1078_s13 = int_to_ptr.vmem [resolvable:$true] %s89_s13 }
  0x48   :  { %s862_s4 = scalar_lea.hbm %s1172_s6, 2048 }
  0x49   :  { %p863_p4 = scmp.ne.s32.totalorder %s1172_s6, %s862_s4  ;;  %p866_p5 = scmp.lt.u32.totalorder %s862_s4, %s1172_s6 }
  0x4b   :  { %p868_p6 = pnand %p866_p5, %p863_p4 }
  0x4d   :  { %871 = shalt.err (!%p868_p6)
}
  0x4e   :  { %s872_s2 = scalar_lea.vmem %s76_s30, 2048  ;;  %p877_p8 = scmp.lt.s32.totalorder %s76_s30, %s76_s30 }
  0x4f   :  { %p873_p7 = scmp.ne.s32.totalorder %s76_s30, %s872_s2  ;;  %p878_p9 = scmp.lt.s32.totalorder %s872_s2, %s872_s2 }
  0x51   :  { %p879_p10 = por %p878_p9, %p877_p8 }
  0x53   :  { %p880_p11 = pnand %p879_p10, %p873_p7 }
  0x55   :  { %883 = shalt.err (!%p880_p11)
}
  0x56   :  { %81 = dma.hbm_to_vmem [thread:$0]  %s1172_s6, 2048, %s76_s30, [#allocation9], %s944_s0, %s944_s0, %s945_s25  }
  0x57   :  { %s884_s22 = scalar_lea.hbm %s1174_s8, 2048 }
  0x58   :  { %p885_p12 = scmp.ne.s32.totalorder %s1174_s8, %s884_s22  ;;  %p888_p13 = scmp.lt.u32.totalorder %s884_s22, %s1174_s8 }
  0x5a   :  { %p890_p0 = pnand %p888_p13, %p885_p12 }
  0x5c   :  { %893 = shalt.err (!%p890_p0)
}
  0x5d   :  { %s894_s29 = scalar_lea.vmem %s1078_s13, 2048  ;;  %p899_p2 = scmp.lt.s32.totalorder %s1078_s13, %s1078_s13 }
  0x5e   :  { %p895_p1 = scmp.ne.s32.totalorder %s1078_s13, %s894_s29  ;;  %p900_p3 = scmp.lt.s32.totalorder %s894_s29, %s894_s29 }
  0x60   :  { %p901_p4 = por %p900_p3, %p899_p2 }
  0x62   :  { %p902_p5 = pnand %p901_p4, %p895_p1 }
  0x64   :  { %905 = shalt.err (!%p902_p5)
}
  0x65   :  { %95 = dma.hbm_to_vmem [thread:$0]  %s1174_s8, 2048, %s1078_s13, [#allocation12], %s944_s0, %s944_s0, %s945_s25  }
  0x66   :  { %928 = dma.done.wait [#allocation3], 128  }
  0x67   :  { %929 = vsyncadd [#allocation3], 4294967168 }
  0x68   :  { %930 = dma.done.wait [#allocation6], 384  }
  0x69   :  { %931 = vsyncadd [#allocation6], 4294966912 }
  0x6a   :  { %932 = dma.done.wait [#allocation9], 6144  }
  0x6b   :  { %933 = vsyncadd [#allocation9], 4294961152 }
  0x6c   :  { %934 = dma.done.wait [#allocation12], 2048  }
  0x6d   :  { %935 = vsyncadd [#allocation12], 4294965248  ;;  %v948_v0 = vmov 0.0|0.0   ;;  %vm949_vm0 = vmmov 0   ;;  %v950_v1 = vmov 0.0   ;;  %vm130_vm1 = vcmask 1043456  }
  0x6e   :  { %665 = vmatprep.subr.bf16.mxu0 %v948_v0  ;;  %592 = vmatprep.mubr.msk.f32.mxu0 %vm949_vm0, %v950_v1  ;;  %v117_v2 = vld [vmem:[#allocation7] sm:$0xff]  ;;  %v118_v3 = vld [vmem:[#allocation7 + $0x8] sm:$0xf]  ;;  %vm951_vm2 = vmmov 1   ;;  %v116_v5 = vld [vmem:[#allocation2] sm:$0xff]  ;;  %vm126_vm4 = vcmask 97280  }
  0x6f   :  { %313 = vmatprep.mubr.f32.mxu1 %v950_v1  ;;  %vm667_vm3 = vmpackc.low %vm130_vm1, %vm951_vm2  ;;  %v666_v4 = vpack.c.bf16 %v118_v3, %v117_v2  ;;  %v206_v6 = vld [vmem:[#allocation8 + $0x8] sm:$0xff]  ;;  %v208_v7 = vld [vmem:[#allocation8 + $0x18] sm:$0xff]  ;;  %s952_s13 = smov [#allocation13]  }
  0x70   :  { %v205_v8 = vld [vmem:[#allocation8] sm:$0xff]  ;;  %v669_v9 = vpack.c.bf16 %v208_v7, %v206_v6  ;;  %v207_v10 = vld [vmem:[#allocation8 + $0x10] sm:$0xff]  ;;  %v210_v11 = vld [vmem:[#allocation8 + $0x28] sm:$0xff]  ;;  %s531_s14 = sshll.u32 %s952_s13, 4  ;;  %s532_s14 = int_to_ptr.vmem [resolvable:$true] %s531_s14 }
  0x71   :  { %v212_v12 = vld [vmem:[#allocation8 + $0x38] sm:$0xff]  ;;  %668 = vmatpush3.bf16.msk.msra.mxu0 %vm667_vm3, %v666_v4  ;;  %v671_v13 = vpack.c.bf16 %v207_v10, %v205_v8  ;;  %v209_v15 = vld [vmem:[#allocation8 + $0x20] sm:$0xff]  ;;  %v211_v16 = vld [vmem:[#allocation8 + $0x30] sm:$0xff]  ;;  %s906_s15 = scalar_lea.vmem %s532_s14, 256  ;;  %p911_p7 = scmp.lt.s32.totalorder %s532_s14, %s532_s14 }
  0x72   :  { %v673_v14 = vpack.c.bf16 %v212_v12, %v210_v11  ;;  %v214_v17 = vld [vmem:[#allocation8 + $0x48] sm:$0xff]  ;;  %670 = vmatprep.subr.bf16.mxu1 %v669_v9  ;;  %v216_v18 = vld [vmem:[#allocation8 + $0x58] sm:$0xff]  ;;  %701 = vmatprep.subr.bf16.mxu0 %v948_v0  ;;  %v675_v19 = vpack.c.bf16 %v211_v16, %v209_v15  ;;  %v213_v21 = vld [vmem:[#allocation8 + $0x40] sm:$0xff]  ;;  %p907_p6 = scmp.ne.s32.totalorder %s532_s14, %s906_s15  ;;  %p912_p8 = scmp.lt.s32.totalorder %s906_s15, %s906_s15 }
  0x73   :  { %672 = vmatpush1.bf16.msra.mxu1 %v671_v13  ;;  %v677_v20 = vpack.c.bf16 %v216_v18, %v214_v17  ;;  %v215_v22 = vld [vmem:[#allocation8 + $0x50] sm:$0xff]  ;;  %v218_v23 = vld [vmem:[#allocation8 + $0x68] sm:$0xff]  ;;  %v220_v24 = vld [vmem:[#allocation8 + $0x78] sm:$0xff] }
  0x74   :  { %593 = vmatmul.mubr.msk.f32.vlgmr.msra.gmra.mrb[0].mxu0 %vm126_vm4, %v116_v5  ;;  %674 = vmatprep.subr.bf16.mxu1 %v673_v14  ;;  %v679_v25 = vpack.c.bf16 %v215_v22, %v213_v21  ;;  %v681_v26 = vpack.c.bf16 %v220_v24, %v218_v23  ;;  %v217_v27 = vld [vmem:[#allocation8 + $0x60] sm:$0xff]  ;;  %v219_v28 = vld [vmem:[#allocation8 + $0x70] sm:$0xff]  ;;  %v222_v29 = vld [vmem:[#allocation8 + $0x88] sm:$0xff]  ;;  %p913_p9 = por %p912_p8, %p911_p7 }
  0x75   :  { %627 = vmatprep.mubr.msk.f32.mxu0 %vm949_vm0, %v950_v1  ;;  %v224_v30 = vld [vmem:[#allocation8 + $0x98] sm:$0xff]  ;;  %v683_v31 = vpack.c.bf16 %v219_v28, %v217_v27  ;;  %v221_v33 = vld [vmem:[#allocation8 + $0x80] sm:$0xff]  ;;  %v223_v34 = vld [vmem:[#allocation8 + $0x90] sm:$0xff] }
  0x76   :  { %v685_v32 = vpack.c.bf16 %v224_v30, %v222_v29  ;;  %v687_v35 = vpack.c.bf16 %v223_v34, %v221_v33  ;;  %v226_v36 = vld [vmem:[#allocation8 + $0xa8] sm:$0xff]  ;;  %v228_v37 = vld [vmem:[#allocation8 + $0xb8] sm:$0xff]  ;;  %v225_v39 = vld [vmem:[#allocation8 + $0xa0] sm:$0xff]  ;;  %p914_p10 = pnand %p913_p9, %p907_p6 }
  0x77   :  { %676 = vmatpush1.bf16.msra.mxu1 %v675_v19  ;;  %v689_v38 = vpack.c.bf16 %v228_v37, %v226_v36  ;;  %v227_v40 = vld [vmem:[#allocation8 + $0xb0] sm:$0xff]  ;;  %v230_v42 = vld [vmem:[#allocation8 + $0xc8] sm:$0xff]  ;;  %v232_v43 = vld [vmem:[#allocation8 + $0xd8] sm:$0xff] }
  0x78   :  { %678 = vmatprep.subr.bf16.mxu1 %v677_v20  ;;  %v691_v41 = vpack.c.bf16 %v227_v40, %v225_v39  ;;  %v229_v44 = vld [vmem:[#allocation8 + $0xc0] sm:$0xff]  ;;  %v693_v45 = vpack.c.bf16 %v232_v43, %v230_v42  ;;  %v231_v46 = vld [vmem:[#allocation8 + $0xd0] sm:$0xff]  ;;  %v234_v47 = vld [vmem:[#allocation8 + $0xe8] sm:$0xff] }
  0x79   :  { %v236_v48 = vld [vmem:[#allocation8 + $0xf8] sm:$0xff]  ;;  %v695_v49 = vpack.c.bf16 %v231_v46, %v229_v44  ;;  %v233_v51 = vld [vmem:[#allocation8 + $0xe0] sm:$0xff]  ;;  %v235_v52 = vld [vmem:[#allocation8 + $0xf0] sm:$0xff] }
  0x7a   :  { %v697_v50 = vpack.c.bf16 %v236_v48, %v234_v47  ;;  %v699_v53 = vpack.c.bf16 %v235_v52, %v233_v51  ;;  %v326_v54 = vld [vmem:[#allocation10] sm:$0xff]  ;;  %v327_v55 = vld [vmem:[#allocation10 + $0x8] sm:$0xff]  ;;  %v328_v56 = vld [vmem:[#allocation10 + $0x10] sm:$0xff] }
  0x7b   :  { %680 = vmatpush1.bf16.msra.mxu1 %v679_v25  ;;  %v702_v57 = vpack.c.bf16 %v327_v55, %v326_v54  ;;  %v329_v58 = vld [vmem:[#allocation10 + $0x18] sm:$0xff]  ;;  %v545_v60 = vld [vmem:[%s1169_s3] ss:$0 sm:$0xff]  ;;  %v331_v4 = vld [vmem:[#allocation10 + $0x28] sm:$0xff] }
  0x7c   :  { %682 = vmatprep.subr.bf16.mxu1 %v681_v26  ;;  %v705_v59 = vpack.c.bf16 %v329_v58, %v328_v56  ;;  %v330_v3 = vld [vmem:[#allocation10 + $0x20] sm:$0xff]  ;;  %v332_v6 = vld [vmem:[#allocation10 + $0x30] sm:$0xff]  ;;  %v333_v7 = vld [vmem:[#allocation10 + $0x38] sm:$0xff] }
  0x7d   :  { %703 = vmatpush3.bf16.msra.mxu0 %v702_v57  ;;  %v708_v5 = vpack.c.bf16 %v331_v4, %v330_v3  ;;  %v711_v8 = vpack.c.bf16 %v333_v7, %v332_v6  ;;  %v334_v9 = vld [vmem:[#allocation10 + $0x40] sm:$0xff]  ;;  %v335_v10 = vld [vmem:[#allocation10 + $0x48] sm:$0xff]  ;;  %v336_v12 = vld [vmem:[#allocation10 + $0x50] sm:$0xff] }
  0x7e   :  { %704 = vmatprep.subr.bf16.mxu0 %v948_v0  ;;  %v714_v11 = vpack.c.bf16 %v335_v10, %v334_v9  ;;  %v337_v13 = vld [vmem:[#allocation10 + $0x58] sm:$0xff]  ;;  %v338_v14 = vld [vmem:[#allocation10 + $0x60] sm:$0xff]  ;;  %v339_v15 = vld [vmem:[#allocation10 + $0x68] sm:$0xff] }
  0x7f   :  { %684 = vmatpush1.bf16.msra.mxu1 %v683_v31  ;;  %v720_v16 = vpack.c.bf16 %v339_v15, %v338_v14  ;;  %v340_v17 = vld [vmem:[#allocation10 + $0x70] sm:$0xff]  ;;  %v341_v18 = vld [vmem:[#allocation10 + $0x78] sm:$0xff]  ;;  %v420_v20 = vld [vmem:[#allocation11] sm:$0xff] }
  0x80   :  { %686 = vmatprep.subr.bf16.mxu1 %v685_v32  ;;  %v723_v19 = vpack.c.bf16 %v341_v18, %v340_v17  ;;  %v421_v21 = vld [vmem:[#allocation11 + $0x8] sm:$0xff]  ;;  %v422_v22 = vld [vmem:[#allocation11 + $0x10] sm:$0xff]  ;;  %v423_v24 = vld [vmem:[#allocation11 + $0x18] sm:$0xff] }
  0x81   :  { %706 = vmatpush3.bf16.msra.mxu0 %v705_v59  ;;  %v726_v23 = vpack.c.bf16 %v421_v21, %v420_v20  ;;  %v729_v25 = vpack.c.bf16 %v423_v24, %v422_v22  ;;  %v424_v26 = vld [vmem:[#allocation11 + $0x20] sm:$0xff]  ;;  %v425_v27 = vld [vmem:[#allocation11 + $0x28] sm:$0xff]  ;;  %v426_v29 = vld [vmem:[#allocation11 + $0x30] sm:$0xff] }
  0x82   :  { %707 = vmatprep.subr.bf16.mxu0 %v948_v0  ;;  %v732_v28 = vpack.c.bf16 %v425_v27, %v424_v26  ;;  %v427_v30 = vld [vmem:[#allocation11 + $0x38] sm:$0xff]  ;;  %v428_v32 = vld [vmem:[#allocation11 + $0x40] sm:$0xff]  ;;  %v429_v33 = vld [vmem:[#allocation11 + $0x48] sm:$0xff] }
  0x83   :  { %688 = vmatpush1.bf16.msra.mxu1 %v687_v35  ;;  %v735_v31 = vpack.c.bf16 %v427_v30, %v426_v29  ;;  %v738_v34 = vpack.c.bf16 %v429_v33, %v428_v32  ;;  %v239_v35 = vlaneseq  ;;  %v323_v48 = vld [vmem:[#allocation5] sm:$0xff]  ;;  %v430_v52 = vld [vmem:[#allocation11 + $0x50] sm:$0xff]  ;;  %v432_v55 = vld [vmem:[#allocation11 + $0x60] sm:$0xff] }
  0x84   :  { %690 = vmatprep.subr.bf16.mxu1 %v689_v38  ;;  %v237_v38 = vld [vmem:[%s1171_s5] sm:$0x3]  ;;  %v433_v56 = vld [vmem:[#allocation11 + $0x68] sm:$0xff]  ;;  %v434_v58 = vld [vmem:[#allocation11 + $0x70] sm:$0xff] }
  0x85   :  { %709 = vmatpush3.bf16.msra.mxu0 %v708_v5  ;;  %v240_v36 = vshrl.u32 %v239_v35, 7  ;;  %v744_v57 = vpack.c.bf16 %v433_v56, %v432_v55  ;;  %v435_v59 = vld [vmem:[#allocation11 + $0x78] sm:$0xff] }
  0x86   :  { %710 = vmatprep.subr.bf16.mxu0 %v948_v0 }
  0x87   :  { %692 = vmatpush1.bf16.msra.mxu1 %v691_v41  ;;  %v241_v37 = vsub.s32 0, %v240_v36  ;;  %v245_v39 = vsub.s32 1, %v240_v36 }
  0x88   :  { %694 = vmatprep.subr.bf16.mxu1 %v693_v45 }
  0x89   :  { %712 = vmatpush3.bf16.msra.mxu0 %v711_v8  ;;  %v242_v40 = vrot.slane %v237_v38, %v241_v37  ;;  %v246_v41 = vrot.slane %v237_v38, %v245_v39 }
  0x8a   :  { %713 = vmatprep.subr.bf16.mxu0 %v948_v0 }
  0x8b   :  { %696 = vmatpush1.bf16.msra.mxu1 %v695_v49 }
  0x8c   :  { %698 = vmatprep.subr.bf16.mxu1 %v697_v50 }
  0x8d   :  { %715 = vmatpush3.bf16.msra.mxu0 %v714_v11 }
  0x8e   :  { %716 = vmatprep.subr.bf16.mxu0 %v948_v0 }
  0x8f   :  { %700 = vmatpush1.bf16.msra.mxu1 %v699_v53  ;;  %v431_v53 = vld [vmem:[#allocation11 + $0x58] sm:$0xff] }
  0x90   :  { %725 = vmatprep.subr.bf16.mxu1 %v948_v0  ;;  %v741_v54 = vpack.c.bf16 %v431_v53, %v430_v52 }
 0x147   :  { %v200_v61 = vpop.f32.mrb[0].mxu0 }
 0x148   :  { %v201_v62 = vadd.f32 %v545_v60, %v200_v61  ;;  %v594_v63 = vpop.f32.mrb[1].mxu0  ;;  %v747_v60 = vpack.c.bf16 %v435_v59, %v434_v58  ;;  %v548_v61 = vld [vmem:[%s1173_s7] ss:$0 sm:$0xff] }
 0x14a   :  { %764 = vtanh.f32 %v201_v62 }
 0x154   :  { %v765_v2 = vpop.eup %764 }
 0x155   :  { %314 = vmatmul.mubr.f32.vlgmr.msra.gmra.mrb[0].mxu1 %v765_v2 }
 0x156   :  { %662 = vmatprep.mubr.msk.f32.mxu1 %vm949_vm0, %v950_v1  ;;  %v717_v1 = vpack.c.bf16 %v337_v13, %v336_v12  ;;  %727 = vmatpush3.bf16.msra.mxu1 %v726_v23 }
 0x157   :  { %728 = vmatprep.subr.bf16.mxu1 %v948_v0 }
 0x158   :  { %718 = vmatpush3.bf16.msra.mxu0 %v717_v1 }
 0x159   :  { %719 = vmatprep.subr.bf16.mxu0 %v948_v0 }
 0x15a   :  { %730 = vmatpush3.bf16.msra.mxu1 %v729_v25 }
 0x15b   :  { %731 = vmatprep.subr.bf16.mxu1 %v948_v0 }
 0x15c   :  { %721 = vmatpush3.bf16.msra.mxu0 %v720_v16 }
 0x15d   :  { %722 = vmatprep.subr.bf16.mxu0 %v948_v0 }
 0x15e   :  { %733 = vmatpush3.bf16.msra.mxu1 %v732_v28 }
 0x15f   :  { %734 = vmatprep.subr.bf16.mxu1 %v948_v0 }
 0x160   :  { %724 = vmatpush3.bf16.msra.mxu0 %v723_v19 }
 0x162   :  { %736 = vmatpush3.bf16.msra.mxu1 %v735_v31 }
 0x163   :  { %737 = vmatprep.subr.bf16.mxu1 %v948_v0 }
 0x166   :  { %739 = vmatpush3.bf16.msra.mxu1 %v738_v34 }
 0x167   :  { %740 = vmatprep.subr.bf16.mxu1 %v948_v0 }
 0x16a   :  { %742 = vmatpush3.bf16.msra.mxu1 %v741_v54 }
 0x16b   :  { %743 = vmatprep.subr.bf16.mxu1 %v948_v0 }
 0x16e   :  { %745 = vmatpush3.bf16.msra.mxu1 %v744_v57 }
 0x16f   :  { %746 = vmatprep.subr.bf16.mxu1 %v948_v0 }
 0x172   :  { %748 = vmatpush3.bf16.msra.mxu1 %v747_v60 }
 0x228   :  { %v315_v42 = vpop.f32.mrb[0].mxu1 }
 0x229   :  { %v316_v43 = vadd.f32 %v315_v42, %v242_v40  ;;  %v317_v44 = vpop.f32.mrb[1].mxu1 }
 0x22a   :  { %v318_v45 = vadd.f32 %v317_v44, %v246_v41 }
 0x22b   :  { %521 = vst [vmem:[#allocation13] sm:$0xff] %v316_v43 }
 0x22c   :  { %v320_v46 = vmul.f32 0.5, %v318_v45  ;;  %522 = vst [vmem:[#allocation13 + $0x8] sm:$0xff] %v318_v45 }
 0x22e   :  { %v321_v47 = vmul.f32 1.442695, %v320_v46 }
 0x230   :  { %766 = vpow2.f32 %v321_v47 }
 0x23a   :  { %v767_v49 = vpop.eup %766 }
 0x23b   :  { %v324_v50 = vmul.f32 %v767_v49, %v323_v48 }
 0x23d   :  { %v325_v51 = vadd.f32 %v324_v50, %v316_v43 }
 0x23f   :  { %628 = vmatmul.mubr.f32.vlgmr.msra.gmra.mrb[2].mxu0 %v325_v51 }
 0x312   :  { %v415_v62 = vpop.f32.mrb[2].mxu0 }
 0x313   :  { %v416_v63 = vadd.f32 %v548_v61, %v415_v62  ;;  %v629_v2 = vpop.f32.mrb[3].mxu0 }
 0x315   :  { %768 = vtanh.f32 %v416_v63 }
 0x31f   :  { %v769_v3 = vpop.eup %768 }
 0x320   :  { %663 = vmatmul.mubr.f32.vlgmr.msra.gmra.mrb[2].mxu1 %v769_v3 }
 0x321   :  { %917 = shalt.err (!%p914_p10)
}
 0x322   :  { %s918_s7 = scalar_lea.hbm %s1177_s11, 256 }
 0x323   :  { %p919_p11 = scmp.ne.s32.totalorder %s1177_s11, %s918_s7  ;;  %p922_p12 = scmp.lt.u32.totalorder %s918_s7, %s1177_s11 }
 0x325   :  { %p924_p13 = pnand %p922_p12, %p919_p11 }
 0x327   :  { %927 = shalt.err (!%p924_p13)
}
 0x328   :  { %534 = dma.vmem_to_hbm [thread:$0]  %s532_s14, 256, %s1177_s11, [#allocation4]   ;;  %v549_v0 = vld [vmem:[%s1175_s9] ss:$0 sm:$0xff]  ;;  %vm519_vm5 = vcmask 7168  }
 0x3f3   :  { %v509_v4 = vpop.f32.mrb[2].mxu1 }
 0x3f4   :  { %v510_v5 = vadd.f32 %v549_v0, %v509_v4  ;;  %v664_v6 = vpop.f32.mrb[3].mxu1 }
 0x3f6   :  { %v550_v7 = vmul.f32 -1.442695, %v510_v5 }
 0x3f8   :  { %770 = vpow2.f32 %v550_v7 }
 0x402   :  { %v771_v8 = vpop.eup %770 }
 0x403   :  { %v516_v9 = vadd.f32 1.0, %v771_v8 }
 0x405   :  { %772 = vrcp.f32 %v516_v9 }
 0x40f   :  { %v773_v10 = vpop.eup %772 }
 0x410   :  { %520 = vst.msk [vmem:[%s1176_s10] sm:$0xff] %vm519_vm5, %v773_v10 }
 0x411   :  { %936 = dma.done.wait [#allocation4], 256  }
 0x412   :  { %937 = vsyncadd [#allocation4], 4294967040 }
 0x413   :  { %540 = vsyncpa [#allocation3], 1 }
 0x414   :  { %541 = vsyncpa [#allocation6], 1 }
 0x415   :  { %542 = vsyncpa [#allocation9], 1 }
 0x416   :  { %543 = vsyncpa [#allocation12], 1 }
 0x417   :  { %544 = vsyncpa [#allocation4], 1 }

</bundles_post_ra>
